<compile_context>
chip_gen: v6e
topology: v6e:2x2x1
jax: 0.10.0
libtpu: 0.0.40
codegen_flags: <defaults>
</compile_context>

<pallas_src>
import functools

import jax
import jax.numpy as jnp
from jax.experimental import pallas as pl
from jax.experimental.pallas import tpu as pltpu

BN_EPS = 1e-5


def _round_up(x, m):
    return (x + m - 1) // m * m


def _vmem_limit_bytes():
    """Half of physical VMEM (64 MiB on v5e/v6e, 32 MiB on v7x); safe 32 MiB fallback."""
    try:
        cap = int(pltpu.get_tpu_info().vmem_capacity_bytes)
        return max(16 * 1024 * 1024, min(cap // 2, 64 * 1024 * 1024))
    except Exception:
        return 32 * 1024 * 1024


def _compiler_params(vmem_limit_bytes):
    return pltpu.CompilerParams(
        dimension_semantics=("parallel", "parallel"),   # (B, n_tiles) -> megacore shard
        vmem_limit_bytes=int(vmem_limit_bytes),
    )


def _pick_tile_m(k, c_in, c_outs, cd_size, vmem_limit_bytes):
    """Largest tile_m whose double-buffered DMA tiles PLUS in-kernel f32 temporaries
    fit inside the scoped-VMEM limit (honest budget, per the perf review)."""
    c_max = max(c_outs)
    c_prev_max = max([c_in] + list(c_outs))
    per_m = k * (
        2 * c_prev_max * cd_size   # input activation tile, double-buffered
        + 2 * c_max * cd_size      # output activation tile, double-buffered
        + 4 * c_max * 4            # ~4 f32-sized in-kernel temps (x, y, y*y, cast copy)
    )
    budget = max(int(vmem_limit_bytes * 0.5), 1 << 20)
    tm = budget // max(per_m, 1)
    if tm >= 128:
        return int(min((tm // 128) * 128, 2048))
    return int(max(8, (tm // 8) * 8))


# --------------------------------------------------------------------------- kernels
def _layer0_kernel(k, q_ref, nb_ref, wq_ref, ws_ref, y_ref, stats_ref):
    """y0 = q @ (Wq - Ws) + nb @ Ws  (edge feature [q, nb-q]; bias folded into BN)."""
    q = q_ref[0]                                             # (TM, C_in)   compute dtype
    nb = nb_ref[0]                                           # (TM*k, C_in) compute dtype
    tm = q.shape[0]
    qc = jnp.dot(q, wq_ref[...], preferred_element_type=jnp.float32)    # (TM, C0) f32
    nc = jnp.dot(nb, ws_ref[...], preferred_element_type=jnp.float32)   # (TM*k, C0) f32
    # (TM*k, C0) -> (TM, k, C0) is layout-free when k % 8 == 0.
    y = nc.reshape(tm, k, nc.shape[1]) + qc[:, None, :]
    s1 = jnp.sum(y, axis=(0, 1), keepdims=True)[0]           # (1, C0)
    s2 = jnp.sum(y * y, axis=(0, 1), keepdims=True)[0]       # (1, C0)
    stats_ref[0, 0] = jnp.concatenate([s1, s2], axis=0)      # (2, C0)
    y_ref[0] = y.reshape(tm * k, -1).astype(y_ref.dtype)


def _mid_kernel(y_in_ref, scale_ref, shift_ref, w_ref, y_out_ref, stats_ref):
    """x = relu(y_prev*scale + shift) (f32 math);  y = x @ W;  emit partial stats."""
    y_prev = y_in_ref[0]                                     # (TM*k, Cp) compute dtype
    # scale/shift are f32 -> the affine + ReLU runs in f32 vregs (v5e friendly).
    x = jnp.maximum(y_prev * scale_ref[...] + shift_ref[...], 0.0)
    y = jnp.dot(x.astype(w_ref.dtype), w_ref[...],
                preferred_element_type=jnp.float32)          # (TM*k, Cout) f32, pre-bias
    s1 = jnp.sum(y, axis=0, keepdims=True)
    s2 = jnp.sum(y * y, axis=0, keepdims=True)
    stats_ref[0, 0] = jnp.concatenate([s1, s2], axis=0)
    y_out_ref[0] = y.astype(y_out_ref.dtype)


def _final_kernel(k, y_in_ref, scale_ref, shift_ref, out_ref):
    """x = relu(y_last*scale + shift);  out = max over k  (plain (TM, C) store)."""
    y = y_in_ref[0]                                          # (TM*k, C) compute dtype
    x = jnp.maximum(y * scale_ref[...] + shift_ref[...], 0.0)
    tmk, c = x.shape
    out_ref[0] = jnp.max(x.reshape(tmk // k, k, c), axis=1).astype(out_ref.dtype)


def _final_kernel_t(k, y_in_ref, scale_ref, shift_ref, out_ref):
    """Same as _final_kernel but stores transposed (C, TM): lane-dense along M."""
    y = y_in_ref[0]
    x = jnp.maximum(y * scale_ref[...] + shift_ref[...], 0.0)
    tmk, c = x.shape
    xm = jnp.max(x.reshape(tmk // k, k, c), axis=1)          # (TM, C)
    out_ref[0] = xm.T.astype(out_ref.dtype)                  # (C, TM)


# --------------------------------------------------------------------------- wrapper
def _fold_norm(stats, gamma, beta, count, n_pad, pad_y):
    """Per-tile [sum, sum^2] of the PRE-BIAS activations -> per-channel affine
    (y*scale + shift).  The Conv bias is removed exactly by BN's mean subtraction,
    so it never appears.  Padded-M-row contributions (per-channel constants pad_y)
    are subtracted analytically here instead of being masked in-kernel."""
    tot = jnp.sum(stats.astype(jnp.float32), axis=(0, 1))    # (2, C)
    s1 = tot[0] - n_pad * pad_y
    s2 = tot[1] - n_pad * pad_y * pad_y
    mean = s1 / count
    var = jnp.maximum(s2 / count - mean * mean, 0.0)         # biased var (BN forward)
    scale = gamma * jax.lax.rsqrt(var + BN_EPS)
    shift = beta - mean * scale
    return scale.reshape(1, -1), shift.reshape(1, -1)


def edge_conv_forward(q_feats, s_feats, neighbor_indices, params,
                      *, tile_m=None, compute_dtype=jnp.float32):
    """EdgeConv batch-mode forward.

    q_feats: (B, C_in, M), s_feats: (B, C_in, N), neighbor_indices: (B, M, k) int32.
    params:  [(W, b, gamma, beta), ...] with W: (in_dim, out_dim) (= conv weight^T),
             in_dim = 2*C_in for level 0.  Returns (B, C_out_last, M) float32.
    Note: b is accepted for API parity but is mathematically a no-op under the
    default BatchNorm (batch statistics) and is folded away.
    """
    B, c_in, M = q_feats.shape
    k = int(neighbor_indices.shape[2])
    num_layers = len(params)
    c_outs = [int(p[0].shape[1]) for p in params]
    assert params[0][0].shape[0] == 2 * c_in

    vmem_limit = _vmem_limit_bytes()
    cd_size = jnp.dtype(compute_dtype).itemsize
    if tile_m is None:
        tile_m = _pick_tile_m(k, c_in, c_outs, cd_size, vmem_limit)
    tile_m = max(8, min(_round_up(int(tile_m), 8), _round_up(M, 8)))
    m_pad = _round_up(M, tile_m)
    n_tiles = m_pad // tile_m

    # ---- JAX-side glue: layout + neighbor gather (smallest tensor streamed). ----
    # TODO(synk): the scattered row gather stays in XLA; an in-kernel gather from a
    # VMEM-resident s_feats would remove this extra HBM round trip of the nb tensor.
    q = jnp.transpose(q_feats, (0, 2, 1))                    # (B, M, C_in)
    s = jnp.transpose(s_feats, (0, 2, 1))                    # (B, N, C_in)
    nb = jax.vmap(lambda sb, ib: jnp.take(sb, ib, axis=0))(s, neighbor_indices)
    q = jnp.pad(q, ((0, 0), (0, m_pad - M), (0, 0))).astype(compute_dtype)
    nb = jnp.pad(nb, ((0, 0), (0, m_pad - M), (0, 0), (0, 0))).astype(compute_dtype)
    nb = nb.reshape(B, m_pad * k, c_in)                      # contiguous, matmul-ready

    gammas = [p[2].astype(jnp.float32) for p in params]
    betas = [p[3].astype(jnp.float32) for p in params]

    # Split first-layer weight:  y0 = q @ (Wq - Ws) + nb @ Ws.  No channel padding.
    W0 = params[0][0].astype(jnp.float32)
    wq = (W0[:c_in] - W0[c_in:]).astype(compute_dtype)
    ws = W0[c_in:].astype(compute_dtype)
    mid_ws = [params[l][0].astype(compute_dtype) for l in range(1, num_layers)]

    grid = (B, n_tiles)
    count = float(B * M * k)                                 # real elements per channel
    n_pad_rows = float(B * (m_pad - M) * k)                  # padded elements per channel
    cparams = _compiler_params(vmem_limit)

    def _full_spec(shape):
        nd = len(shape)
        return pl.BlockSpec(shape, lambda b, i, _nd=nd: (0,) * _nd)

    # ---- Layer 0: split-weight conv + per-tile stats (real channel count). ----
    c0 = c_outs[0]
    y, stats = pl.pallas_call(
        functools.partial(_layer0_kernel, k),
        grid=grid,
        in_specs=[
            pl.BlockSpec((1, tile_m, c_in), lambda b, i: (b, i, 0)),
            pl.BlockSpec((1, tile_m * k, c_in), lambda b, i: (b, i, 0)),
            _full_spec(wq.shape),
            _full_spec(ws.shape),
        ],
        out_specs=(
            pl.BlockSpec((1, tile_m * k, c0), lambda b, i: (b, i, 0)),
            pl.BlockSpec((1, 1, 2, c0), lambda b, i: (b, i, 0, 0)),
        ),
        out_shape=(
            jax.ShapeDtypeStruct((B, m_pad * k, c0), compute_dtype),
            jax.ShapeDtypeStruct((B, n_tiles, 2, c0), jnp.float32),
        ),
        compiler_params=cparams,
    )(q, nb, wq, ws)

    # Padded rows have q = 0 and nb = 0, so their (pre-bias) layer-0 value is
    # exactly 0 per channel; we track this constant through the network so the
    # stats correction in _fold_norm stays exact without any in-kernel masking.
    pad_y = jnp.zeros((c0,), jnp.float32)

    # ---- Middle layers: fused (norm + ReLU) of layer l-1 with the conv of layer l. ----
    for l in range(1, num_layers):
        scale, shift = _fold_norm(stats, gammas[l - 1], betas[l - 1],
                                  count, n_pad_rows, pad_y)
        c_prev, c_out = c_outs[l - 1], c_outs[l]

        # Propagate the padded-row constant through this layer (mirrors kernel math
        # on the compute-dtype stored value; used only for the stats correction).
        x_pad = jnp.maximum(pad_y.astype(compute_dtype) * scale[0] + shift[0], 0.0)
        pad_y = jnp.dot(x_pad.astype(compute_dtype)[None, :], mid_ws[l - 1],
                        preferred_element_type=jnp.float32)[0]

        y, stats = pl.pallas_call(
            _mid_kernel,
            grid=grid,
            in_specs=[
                pl.BlockSpec((1, tile_m * k, c_prev), lambda b, i: (b, i, 0)),
                _full_spec(scale.shape),
                _full_spec(shift.shape),
                _full_spec(mid_ws[l - 1].shape),
            ],
            out_specs=(
                pl.BlockSpec((1, tile_m * k, c_out), lambda b, i: (b, i, 0)),
                pl.BlockSpec((1, 1, 2, c_out), lambda b, i: (b, i, 0, 0)),
            ),
            out_shape=(
                jax.ShapeDtypeStruct((B, m_pad * k, c_out), compute_dtype),
                jax.ShapeDtypeStruct((B, n_tiles, 2, c_out), jnp.float32),
            ),
            compiler_params=cparams,
        )(y, scale, shift, mid_ws[l - 1])

    # ---- Final: fused (norm + ReLU) of the last layer + max over k. ----
    scale, shift = _fold_norm(stats, gammas[-1], betas[-1], count, n_pad_rows, pad_y)
    c_last = c_outs[-1]
    y_spec = pl.BlockSpec((1, tile_m * k, c_last), lambda b, i: (b, i, 0))

    # Transposed (lane dim = M) store when the block obeys the (8,128) rule; it
    # removes the wrapper-side XLA transpose of the whole output.
    if tile_m % 128 == 0 or tile_m == m_pad:
        out_p = pl.pallas_call(
            functools.partial(_final_kernel_t, k),
            grid=grid,
            in_specs=[y_spec, _full_spec(scale.shape), _full_spec(shift.shape)],
            out_specs=pl.BlockSpec((1, c_last, tile_m), lambda b, i: (b, 0, i)),
            out_shape=jax.ShapeDtypeStruct((B, c_last, m_pad), jnp.float32),
            compiler_params=cparams,
        )(y, scale, shift)
        return out_p[:, :, :M]                               # (B, C_out, M)

    out_p = pl.pallas_call(
        functools.partial(_final_kernel, k),
        grid=grid,
        in_specs=[y_spec, _full_spec(scale.shape), _full_spec(shift.shape)],
        out_specs=pl.BlockSpec((1, tile_m, c_last), lambda b, i: (b, i, 0)),
        out_shape=jax.ShapeDtypeStruct((B, m_pad, c_last), jnp.float32),
        compiler_params=cparams,
    )(y, scale, shift)
    return jnp.transpose(out_p[:, :M, :], (0, 2, 1))         # (B, C_out, M)


# --------------------------------------------------------------------------- reference
def _reference(q_feats, s_feats, neighbor_indices, params):
    """Pure-JAX reference mirroring the PyTorch forward (Conv2d -> BN(batch stats) -> ReLU)."""
    q = jnp.transpose(q_feats, (0, 2, 1)).astype(jnp.float32)
    s = jnp.transpose(s_feats, (0, 2, 1)).astype(jnp.float32)
    nb = jax.vmap(lambda sb, ib: jnp.take(sb, ib, axis=0))(s, neighbor_indices)
    qb = jnp.broadcast_to(q[:, :, None, :], nb.shape)
    x = jnp.concatenate([qb, nb - qb], axis=-1)              # (B, M, k, 2*C_in)
    for (W, b, gamma, beta) in params:
        y = jnp.einsum('bmkc,cd->bmkd', x, W,
                       preferred_element_type=jnp.float32) + b
        mean = jnp.mean(y, axis=(0, 1, 2))
        var = jnp.mean(jnp.square(y - mean), axis=(0, 1, 2))
        y = (y - mean) * jax.lax.rsqrt(var + BN_EPS) * gamma + beta
        x = jnp.maximum(y, 0.0)
    return jnp.transpose(jnp.max(x, axis=2), (0, 2, 1))      # (B, C_out, M)


if __name__ == "__main__":
    key = jax.random.PRNGKey(0)
    B, C_in, M, N, K = 2, 4, 20, 24, 8       # M=20 so M % tile_m != 0 is exercised
    output_dims = [32, 32]

    k1, k2, k3, kp = jax.random.split(key, 4)
    q_feats = jax.random.normal(k1, (B, C_in, M), dtype=jnp.float32)
    s_feats = jax.random.normal(k2, (B, C_in, N), dtype=jnp.float32)
    neighbor_indices = jax.random.randint(k3, (B, M, K), 0, N, dtype=jnp.int32)

    params = []
    in_dim = 2 * C_in
    for out_dim in output_dims:
        kp, kw, kb, kg, kbe = jax.random.split(kp, 5)
        bound = 1.0 / jnp.sqrt(jnp.float32(in_dim))
        W = jax.random.uniform(kw, (in_dim, out_dim), jnp.float32, -bound, bound)
        b = jax.random.uniform(kb, (out_dim,), jnp.float32, -bound, bound)
        gamma = 1.0 + 0.1 * jax.random.normal(kg, (out_dim,), jnp.float32)
        beta = 0.1 * jax.random.normal(kbe, (out_dim,), jnp.float32)
        params.append((W, b, gamma, beta))
        in_dim = out_dim

    ref = _reference(q_feats, s_feats, neighbor_indices, params)

    # Run 1: f32, tile_m=8 -> multi-tile cross-tile BN reduction + analytic
    # padded-row correction (m_pad=24 > M=20) + plain-output path.
    fwd_f32 = jax.jit(functools.partial(edge_conv_forward, tile_m=8,
                                        compute_dtype=jnp.float32))
    out = jax.block_until_ready(fwd_f32(q_feats, s_feats, neighbor_indices, params))
    assert out.shape == (B, output_dims[-1], M), out.shape
    assert jnp.allclose(out, ref, atol=2e-2, rtol=2e-2), \
        float(jnp.max(jnp.abs(out - ref)))

    # Run 2: bf16 MXU operands / bf16 inter-layer storage, auto tile (single tile
    # -> transposed lane-dense output path); stats / normalization stay in f32.
    fwd_bf16 = jax.jit(functools.partial(edge_conv_forward,
                                         compute_dtype=jnp.bfloat16))
    out_bf16 = jax.block_until_ready(
        fwd_bf16(q_feats, s_feats, neighbor_indices, params))
    assert out_bf16.shape == (B, output_dims[-1], M)
    assert jnp.allclose(out_bf16, ref, atol=1.5e-1, rtol=1.5e-1), \
        float(jnp.max(jnp.abs(out_bf16 - ref)))

    print("KERNEL_OK")
</pallas_src>

<mosaic_0001>
module attributes {stable_mosaic.version = 11 : i64} {
  func.func @_layer0_kernel(%arg0: i32, %arg1: i32, %arg2: memref<1x8x4xf32, #tpu.memory_space<vmem>>, %arg3: memref<1x64x4xf32, #tpu.memory_space<vmem>>, %arg4: memref<4x32xf32, #tpu.memory_space<vmem>>, %arg5: memref<4x32xf32, #tpu.memory_space<vmem>>, %arg6: memref<1x64x32xf32, #tpu.memory_space<vmem>>, %arg7: memref<1x1x2x32xf32, #tpu.memory_space<vmem>>) attributes {dimension_semantics = [#tpu.dimension_semantics<parallel>, #tpu.dimension_semantics<parallel>], iteration_bounds = array<i64: 2, 3>, scalar_prefetch = 0 : i64, scratch_operands = 0 : i64, tpu.core_type = #tpu.core_type<tc>, window_params = [{transform_indices = @transform_0, window_bounds = array<i64: 1, 8, 4>}, {transform_indices = @transform_1, window_bounds = array<i64: 1, 64, 4>}, {pipeline_mode = #tpu.pipeline_mode<synchronous>, transform_indices = @transform_2, window_bounds = array<i64: 4, 32>}, {pipeline_mode = #tpu.pipeline_mode<synchronous>, transform_indices = @transform_3, window_bounds = array<i64: 4, 32>}, {transform_indices = @transform_4, window_bounds = array<i64: 1, 64, 32>}, {transform_indices = @transform_5, window_bounds = array<i64: 1, 1, 2, 32>}]} {
    %c0 = arith.constant 0 : index
    %c0_0 = arith.constant 0 : index
    %c0_1 = arith.constant 0 : index
    %0 = vector.load %arg2[%c0, %c0_0, %c0_1] : memref<1x8x4xf32, #tpu.memory_space<vmem>>, vector<1x8x4xf32>
    %1 = vector.shape_cast %0 : vector<1x8x4xf32> to vector<8x4xf32>
    %c0_2 = arith.constant 0 : index
    %c0_3 = arith.constant 0 : index
    %c0_4 = arith.constant 0 : index
    %2 = vector.load %arg3[%c0_2, %c0_3, %c0_4] : memref<1x64x4xf32, #tpu.memory_space<vmem>>, vector<1x64x4xf32>
    %3 = vector.shape_cast %2 : vector<1x64x4xf32> to vector<64x4xf32>
    %c0_5 = arith.constant 0 : index
    %c0_6 = arith.constant 0 : index
    %4 = vector.load %arg4[%c0_5, %c0_6] : memref<4x32xf32, #tpu.memory_space<vmem>>, vector<4x32xf32>
    %cst = arith.constant dense<0.000000e+00> : vector<8x32xf32>
    %5 = tpu.matmul %1, %4, %cst {dimension_numbers = #tpu.dot_dimension_numbers<[1], [0], [0], [1], [0, 0, 1, 1], [], []>} : vector<8x4xf32>, vector<4x32xf32>, vector<8x32xf32> -> vector<8x32xf32>
    %c0_7 = arith.constant 0 : index
    %c0_8 = arith.constant 0 : index
    %6 = vector.load %arg5[%c0_7, %c0_8] : memref<4x32xf32, #tpu.memory_space<vmem>>, vector<4x32xf32>
    %cst_9 = arith.constant dense<0.000000e+00> : vector<64x32xf32>
    %7 = tpu.matmul %3, %6, %cst_9 {dimension_numbers = #tpu.dot_dimension_numbers<[1], [0], [0], [1], [0, 0, 1, 1], [], []>} : vector<64x4xf32>, vector<4x32xf32>, vector<64x32xf32> -> vector<64x32xf32>
    %8 = vector.shape_cast %7 : vector<64x32xf32> to vector<8x8x32xf32>
    %9 = vector.shape_cast %5 : vector<8x32xf32> to vector<8x1x32xf32>
    %10 = vector.broadcast %9 : vector<8x1x32xf32> to vector<8x8x32xf32>
    %11 = arith.addf %8, %10 : vector<8x8x32xf32>
    %cst_10 = arith.constant dense<0.000000e+00> : vector<32xf32>
    %12 = vector.multi_reduction <add>, %11, %cst_10 [0, 1] : vector<8x8x32xf32> to vector<32xf32>
    %13 = vector.shape_cast %12 : vector<32xf32> to vector<1x1x32xf32>
    %14 = vector.shape_cast %13 : vector<1x1x32xf32> to vector<1x32xf32>
    %15 = arith.mulf %11, %11 : vector<8x8x32xf32>
    %cst_11 = arith.constant dense<0.000000e+00> : vector<32xf32>
    %16 = vector.multi_reduction <add>, %15, %cst_11 [0, 1] : vector<8x8x32xf32> to vector<32xf32>
    %17 = vector.shape_cast %16 : vector<32xf32> to vector<1x1x32xf32>
    %18 = vector.shape_cast %17 : vector<1x1x32xf32> to vector<1x32xf32>
    %19 = tpu.concatenate %14, %18 in 0 : vector<1x32xf32>, vector<1x32xf32> -> vector<2x32xf32>
    %c0_12 = arith.constant 0 : index
    %c0_13 = arith.constant 0 : index
    %c0_14 = arith.constant 0 : index
    %c0_15 = arith.constant 0 : index
    %20 = vector.load %arg7[%c0_12, %c0_13, %c0_14, %c0_15] : memref<1x1x2x32xf32, #tpu.memory_space<vmem>>, vector<1x1x2x32xf32>
    %21 = vector.shape_cast %20 : vector<1x1x2x32xf32> to vector<2x32xf32>
    %22 = vector.shape_cast %19 : vector<2x32xf32> to vector<1x1x2x32xf32>
    tpu.vector_store %arg7[%c0_12, %c0_13, %c0_14, %c0_15], %22 {strides = array<i32>} : memref<1x1x2x32xf32, #tpu.memory_space<vmem>>, vector<1x1x2x32xf32>,
    %23 = vector.shape_cast %11 : vector<8x8x32xf32> to vector<64x32xf32>
    %c0_16 = arith.constant 0 : index
    %c0_17 = arith.constant 0 : index
    %c0_18 = arith.constant 0 : index
    %24 = vector.load %arg6[%c0_16, %c0_17, %c0_18] : memref<1x64x32xf32, #tpu.memory_space<vmem>>, vector<1x64x32xf32>
    %25 = vector.shape_cast %24 : vector<1x64x32xf32> to vector<64x32xf32>
    %26 = vector.shape_cast %23 : vector<64x32xf32> to vector<1x64x32xf32>
    tpu.vector_store %arg6[%c0_16, %c0_17, %c0_18], %26 {strides = array<i32>} : memref<1x64x32xf32, #tpu.memory_space<vmem>>, vector<1x64x32xf32>,
    return
  }
  func.func @transform_0(%arg0: i32, %arg1: i32) -> (i32, i32, i32) {
    %c0_i32 = arith.constant 0 : i32
    %c0_i32_0 = arith.constant 0 : i32
    return %arg0, %arg1, %c0_i32 : i32, i32, i32
  }
  func.func @transform_1(%arg0: i32, %arg1: i32) -> (i32, i32, i32) {
    %c0_i32 = arith.constant 0 : i32
    %c0_i32_0 = arith.constant 0 : i32
    return %arg0, %arg1, %c0_i32 : i32, i32, i32
  }
  func.func @transform_2(%arg0: i32, %arg1: i32) -> (i32, i32) {
    %c0_i32 = arith.constant 0 : i32
    %c0_i32_0 = arith.constant 0 : i32
    %c0_i32_1 = arith.constant 0 : i32
    return %c0_i32, %c0_i32_0 : i32, i32
  }
  func.func @transform_3(%arg0: i32, %arg1: i32) -> (i32, i32) {
    %c0_i32 = arith.constant 0 : i32
    %c0_i32_0 = arith.constant 0 : i32
    %c0_i32_1 = arith.constant 0 : i32
    return %c0_i32, %c0_i32_0 : i32, i32
  }
  func.func @transform_4(%arg0: i32, %arg1: i32) -> (i32, i32, i32) {
    %c0_i32 = arith.constant 0 : i32
    %c0_i32_0 = arith.constant 0 : i32
    return %arg0, %arg1, %c0_i32 : i32, i32, i32
  }
  func.func @transform_5(%arg0: i32, %arg1: i32) -> (i32, i32, i32, i32) {
    %c0_i32 = arith.constant 0 : i32
    %c0_i32_0 = arith.constant 0 : i32
    %c0_i32_1 = arith.constant 0 : i32
    return %arg0, %arg1, %c0_i32, %c0_i32_0 : i32, i32, i32, i32
  }
}

module attributes {stable_mosaic.version = 11 : i64} {
  func.func @_mid_kernel(%arg0: i32, %arg1: i32, %arg2: memref<1x64x32xf32, #tpu.memory_space<vmem>>, %arg3: memref<1x32xf32, #tpu.memory_space<vmem>>, %arg4: memref<1x32xf32, #tpu.memory_space<vmem>>, %arg5: memref<32x32xf32, #tpu.memory_space<vmem>>, %arg6: memref<1x64x32xf32, #tpu.memory_space<vmem>>, %arg7: memref<1x1x2x32xf32, #tpu.memory_space<vmem>>) attributes {dimension_semantics = [#tpu.dimension_semantics<parallel>, #tpu.dimension_semantics<parallel>], iteration_bounds = array<i64: 2, 3>, scalar_prefetch = 0 : i64, scratch_operands = 0 : i64, tpu.core_type = #tpu.core_type<tc>, window_params = [{transform_indices = @transform_0, window_bounds = array<i64: 1, 64, 32>}, {pipeline_mode = #tpu.pipeline_mode<synchronous>, transform_indices = @transform_1, window_bounds = array<i64: 1, 32>}, {pipeline_mode = #tpu.pipeline_mode<synchronous>, transform_indices = @transform_2, window_bounds = array<i64: 1, 32>}, {pipeline_mode = #tpu.pipeline_mode<synchronous>, transform_indices = @transform_3, window_bounds = array<i64: 32, 32>}, {transform_indices = @transform_4, window_bounds = array<i64: 1, 64, 32>}, {transform_indices = @transform_5, window_bounds = array<i64: 1, 1, 2, 32>}]} {
    %c0 = arith.constant 0 : index
    %c0_0 = arith.constant 0 : index
    %c0_1 = arith.constant 0 : index
    %0 = vector.load %arg2[%c0, %c0_0, %c0_1] : memref<1x64x32xf32, #tpu.memory_space<vmem>>, vector<1x64x32xf32>
    %1 = vector.shape_cast %0 : vector<1x64x32xf32> to vector<64x32xf32>
    %c0_2 = arith.constant 0 : index
    %c0_3 = arith.constant 0 : index
    %2 = vector.load %arg3[%c0_2, %c0_3] : memref<1x32xf32, #tpu.memory_space<vmem>>, vector<1x32xf32>
    %3 = vector.broadcast %2 : vector<1x32xf32> to vector<64x32xf32>
    %4 = arith.mulf %1, %3 : vector<64x32xf32>
    %c0_4 = arith.constant 0 : index
    %c0_5 = arith.constant 0 : index
    %5 = vector.load %arg4[%c0_4, %c0_5] : memref<1x32xf32, #tpu.memory_space<vmem>>, vector<1x32xf32>
    %6 = vector.broadcast %5 : vector<1x32xf32> to vector<64x32xf32>
    %7 = arith.addf %4, %6 : vector<64x32xf32>
    %cst = arith.constant 0.000000e+00 : f32
    %8 = vector.broadcast %cst : f32 to vector<64x32xf32>
    %9 = arith.maximumf %7, %8 : vector<64x32xf32>
    %c0_6 = arith.constant 0 : index
    %c0_7 = arith.constant 0 : index
    %10 = vector.load %arg5[%c0_6, %c0_7] : memref<32x32xf32, #tpu.memory_space<vmem>>, vector<32x32xf32>
    %cst_8 = arith.constant dense<0.000000e+00> : vector<64x32xf32>
    %11 = tpu.matmul %9, %10, %cst_8 {dimension_numbers = #tpu.dot_dimension_numbers<[1], [0], [0], [1], [0, 0, 1, 1], [], []>} : vector<64x32xf32>, vector<32x32xf32>, vector<64x32xf32> -> vector<64x32xf32>
    %cst_9 = arith.constant dense<0.000000e+00> : vector<32xf32>
    %12 = vector.multi_reduction <add>, %11, %cst_9 [0] : vector<64x32xf32> to vector<32xf32>
    %13 = vector.shape_cast %12 : vector<32xf32> to vector<1x32xf32>
    %14 = arith.mulf %11, %11 : vector<64x32xf32>
    %cst_10 = arith.constant dense<0.000000e+00> : vector<32xf32>
    %15 = vector.multi_reduction <add>, %14, %cst_10 [0] : vector<64x32xf32> to vector<32xf32>
    %16 = vector.shape_cast %15 : vector<32xf32> to vector<1x32xf32>
    %17 = tpu.concatenate %13, %16 in 0 : vector<1x32xf32>, vector<1x32xf32> -> vector<2x32xf32>
    %c0_11 = arith.constant 0 : index
    %c0_12 = arith.constant 0 : index
    %c0_13 = arith.constant 0 : index
    %c0_14 = arith.constant 0 : index
    %18 = vector.load %arg7[%c0_11, %c0_12, %c0_13, %c0_14] : memref<1x1x2x32xf32, #tpu.memory_space<vmem>>, vector<1x1x2x32xf32>
    %19 = vector.shape_cast %18 : vector<1x1x2x32xf32> to vector<2x32xf32>
    %20 = vector.shape_cast %17 : vector<2x32xf32> to vector<1x1x2x32xf32>
    tpu.vector_store %arg7[%c0_11, %c0_12, %c0_13, %c0_14], %20 {strides = array<i32>} : memref<1x1x2x32xf32, #tpu.memory_space<vmem>>, vector<1x1x2x32xf32>,
    %c0_15 = arith.constant 0 : index
    %c0_16 = arith.constant 0 : index
    %c0_17 = arith.constant 0 : index
    %21 = vector.load %arg6[%c0_15, %c0_16, %c0_17] : memref<1x64x32xf32, #tpu.memory_space<vmem>>, vector<1x64x32xf32>
    %22 = vector.shape_cast %21 : vector<1x64x32xf32> to vector<64x32xf32>
    %23 = vector.shape_cast %11 : vector<64x32xf32> to vector<1x64x32xf32>
    tpu.vector_store %arg6[%c0_15, %c0_16, %c0_17], %23 {strides = array<i32>} : memref<1x64x32xf32, #tpu.memory_space<vmem>>, vector<1x64x32xf32>,
    return
  }
  func.func @transform_0(%arg0: i32, %arg1: i32) -> (i32, i32, i32) {
    %c0_i32 = arith.constant 0 : i32
    %c0_i32_0 = arith.constant 0 : i32
    return %arg0, %arg1, %c0_i32 : i32, i32, i32
  }
  func.func @transform_1(%arg0: i32, %arg1: i32) -> (i32, i32) {
    %c0_i32 = arith.constant 0 : i32
    %c0_i32_0 = arith.constant 0 : i32
    %c0_i32_1 = arith.constant 0 : i32
    return %c0_i32, %c0_i32_0 : i32, i32
  }
  func.func @transform_2(%arg0: i32, %arg1: i32) -> (i32, i32) {
    %c0_i32 = arith.constant 0 : i32
    %c0_i32_0 = arith.constant 0 : i32
    %c0_i32_1 = arith.constant 0 : i32
    return %c0_i32, %c0_i32_0 : i32, i32
  }
  func.func @transform_3(%arg0: i32, %arg1: i32) -> (i32, i32) {
    %c0_i32 = arith.constant 0 : i32
    %c0_i32_0 = arith.constant 0 : i32
    %c0_i32_1 = arith.constant 0 : i32
    return %c0_i32, %c0_i32_0 : i32, i32
  }
  func.func @transform_4(%arg0: i32, %arg1: i32) -> (i32, i32, i32) {
    %c0_i32 = arith.constant 0 : i32
    %c0_i32_0 = arith.constant 0 : i32
    return %arg0, %arg1, %c0_i32 : i32, i32, i32
  }
  func.func @transform_5(%arg0: i32, %arg1: i32) -> (i32, i32, i32, i32) {
    %c0_i32 = arith.constant 0 : i32
    %c0_i32_0 = arith.constant 0 : i32
    %c0_i32_1 = arith.constant 0 : i32
    return %arg0, %arg1, %c0_i32, %c0_i32_0 : i32, i32, i32, i32
  }
}

module attributes {stable_mosaic.version = 11 : i64} {
  func.func @_final_kernel(%arg0: i32, %arg1: i32, %arg2: memref<1x64x32xf32, #tpu.memory_space<vmem>>, %arg3: memref<1x32xf32, #tpu.memory_space<vmem>>, %arg4: memref<1x32xf32, #tpu.memory_space<vmem>>, %arg5: memref<1x8x32xf32, #tpu.memory_space<vmem>>) attributes {dimension_semantics = [#tpu.dimension_semantics<parallel>, #tpu.dimension_semantics<parallel>], iteration_bounds = array<i64: 2, 3>, scalar_prefetch = 0 : i64, scratch_operands = 0 : i64, tpu.core_type = #tpu.core_type<tc>, window_params = [{transform_indices = @transform_0, window_bounds = array<i64: 1, 64, 32>}, {pipeline_mode = #tpu.pipeline_mode<synchronous>, transform_indices = @transform_1, window_bounds = array<i64: 1, 32>}, {pipeline_mode = #tpu.pipeline_mode<synchronous>, transform_indices = @transform_2, window_bounds = array<i64: 1, 32>}, {transform_indices = @transform_3, window_bounds = array<i64: 1, 8, 32>}]} {
    %c0 = arith.constant 0 : index
    %c0_0 = arith.constant 0 : index
    %c0_1 = arith.constant 0 : index
    %0 = vector.load %arg2[%c0, %c0_0, %c0_1] : memref<1x64x32xf32, #tpu.memory_space<vmem>>, vector<1x64x32xf32>
    %1 = vector.shape_cast %0 : vector<1x64x32xf32> to vector<64x32xf32>
    %c0_2 = arith.constant 0 : index
    %c0_3 = arith.constant 0 : index
    %2 = vector.load %arg3[%c0_2, %c0_3] : memref<1x32xf32, #tpu.memory_space<vmem>>, vector<1x32xf32>
    %3 = vector.broadcast %2 : vector<1x32xf32> to vector<64x32xf32>
    %4 = arith.mulf %1, %3 : vector<64x32xf32>
    %c0_4 = arith.constant 0 : index
    %c0_5 = arith.constant 0 : index
    %5 = vector.load %arg4[%c0_4, %c0_5] : memref<1x32xf32, #tpu.memory_space<vmem>>, vector<1x32xf32>
    %6 = vector.broadcast %5 : vector<1x32xf32> to vector<64x32xf32>
    %7 = arith.addf %4, %6 : vector<64x32xf32>
    %cst = arith.constant 0.000000e+00 : f32
    %8 = vector.broadcast %cst : f32 to vector<64x32xf32>
    %9 = arith.maximumf %7, %8 : vector<64x32xf32>
    %10 = vector.shape_cast %9 : vector<64x32xf32> to vector<8x8x32xf32>
    %cst_6 = arith.constant dense<0xFF800000> : vector<8x32xf32>
    %11 = vector.multi_reduction <maximumf>, %10, %cst_6 [1] : vector<8x8x32xf32> to vector<8x32xf32>
    %c0_7 = arith.constant 0 : index
    %c0_8 = arith.constant 0 : index
    %c0_9 = arith.constant 0 : index
    %12 = vector.load %arg5[%c0_7, %c0_8, %c0_9] : memref<1x8x32xf32, #tpu.memory_space<vmem>>, vector<1x8x32xf32>
    %13 = vector.shape_cast %12 : vector<1x8x32xf32> to vector<8x32xf32>
    %14 = vector.shape_cast %11 : vector<8x32xf32> to vector<1x8x32xf32>
    tpu.vector_store %arg5[%c0_7, %c0_8, %c0_9], %14 {strides = array<i32>} : memref<1x8x32xf32, #tpu.memory_space<vmem>>, vector<1x8x32xf32>,
    return
  }
  func.func @transform_0(%arg0: i32, %arg1: i32) -> (i32, i32, i32) {
    %c0_i32 = arith.constant 0 : i32
    %c0_i32_0 = arith.constant 0 : i32
    return %arg0, %arg1, %c0_i32 : i32, i32, i32
  }
  func.func @transform_1(%arg0: i32, %arg1: i32) -> (i32, i32) {
    %c0_i32 = arith.constant 0 : i32
    %c0_i32_0 = arith.constant 0 : i32
    %c0_i32_1 = arith.constant 0 : i32
    return %c0_i32, %c0_i32_0 : i32, i32
  }
  func.func @transform_2(%arg0: i32, %arg1: i32) -> (i32, i32) {
    %c0_i32 = arith.constant 0 : i32
    %c0_i32_0 = arith.constant 0 : i32
    %c0_i32_1 = arith.constant 0 : i32
    return %c0_i32, %c0_i32_0 : i32, i32
  }
  func.func @transform_3(%arg0: i32, %arg1: i32) -> (i32, i32, i32) {
    %c0_i32 = arith.constant 0 : i32
    %c0_i32_0 = arith.constant 0 : i32
    return %arg0, %arg1, %c0_i32 : i32, i32, i32
  }
}

</mosaic_0001>

<bundles_post_ra>
// kernel: edge_conv_forward.3
= control target key start
LH: loop header
LB: loop body
LE: loop exit
PB: predicated region body
PF: predicated region fallthrough
CT: control target
= control target key end

     0   :  { %s1027_s18 = smov 0   ;;  %s1029_s19 = smov 0   ;;  %s1154_s0 = inlined_call_operand.vmem [shape: f32[2,24,4], index: 0, kind: input, shape index: {}]   ;;  %s1155_s1 = inlined_call_operand.vmem [shape: f32[2,192,4], index: 1, kind: input, shape index: {}]   ;;  %s1156_s2 = inlined_call_operand.vmem [shape: f32[4,32], index: 2, kind: input, shape index: {}]   ;;  %s1157_s3 = inlined_call_operand.vmem [shape: f32[4,32], index: 3, kind: input, shape index: {}]   ;;  %s1158_s4 = inlined_call_operand.vmem [shape: f32[2,192,32], index: 4, kind: output, shape index: {0}]   ;;  %s1159_s5 = inlined_call_operand.vmem [shape: f32[2,3,2,32], index: 5, kind: output, shape index: {1}]  }
   0x1   :  { %s1031_s20 = smov 0   ;;  %s1033_s21 = smov 0  }
   0x2   :  { %s1035_s22 = smov 0  }
   0x3 LB: > { %s25_s23 = sadd.s32 1, %s984_s20  ;;  %s28_s24 = sadd.s32 1, %s988_s21  ;;  %s992_s22 = sphi %s1035_s22, %s16_s22   ;;  %s988_s21 = sphi %s1033_s21, %s1163_s21   ;;  %s984_s20 = sphi %s1031_s20, %s1162_s20   ;;  %s980_s19 = sphi %s1029_s19, %s1161_s19   ;;  %s976_s18 = sphi %s1027_s18, %s1160_s18  }
   0x4   : > { %p26_p0 = scmp.ge.s32.totalorder %s25_s23, 3  ;;  %p857_p1 = scmp.ge.s32.totalorder %s992_s22, 1 }
   0x5   : > { %p228_p2 = scmp.lt.s32.totalorder %s992_s22, 7 }
   0x6   : > { %s1165_s23 = smov (%p26_p0, %s25_s23), 0  ;;  %s1167_s24 = smov (!%p26_p0, %s28_s24), %s988_s21 }
   0x7   : > { %p229_p3 = pnand %p857_p1, %p228_p2  ;;  %p30_p4 = scmp.ge.s32.totalorder %s1167_s24, 2 }
   0x8   : > { %p280_p5 = scmp.lt.s32.totalorder (!%p229_p3), %s980_s19, 1  ;;  %p282_p6 = scmp.lt.s32.totalorder (!%p229_p3), %s976_s18, 2 }
   0x9   : > { %s1169_s24 = smov (%p30_p4, %s1167_s24), 0  ;;  %232 = sbr.rel (%p229_p3) target bundleno = 255 (0xff), region = 36 }
   0xa   : > { %s859_s29 = sshll.u32 (!%p229_p3), %s976_s18, 3 }
   0xb   : > { %p291_p7 = scmp.lt.s32.totalorder (!%p229_p3), %s859_s29, 23 }
   0xe   : > { %v325_v0 = vld [vmem:[%s1156_s2] sm:$0xf]  ;;  %vm330_vm0 = vcmask 1043456   ;;  %v994_v1 = vmov 0.0   ;;  %vm995_vm1 = vmmov 0   ;;  %s1171_s19 = smov (!%p280_p5, %s980_s19), 1  ;;  %v542_v14 = vlaneseq }
   0xf   : > { %888 = vmatprep.subr.mxu0 %v994_v1  ;;  %890 = vmatprep.mubr.msk.f32.mxu0 %vm995_vm1, %v994_v1  ;;  %v404_v2 = vld [vmem:[%s1157_s3] sm:$0xf]  ;;  %s1173_s18 = smov (!%p282_p6, %s976_s18), 2  ;;  %s909_s30 = smul.u32 3, %s1171_s19  ;;  %vm326_vm2 = vcmask 31744   ;;  %vm635_vm3 = vcmask 261120  }
  0x10   : > { %889 = vmatpush3.msk.msra.mxu0 %vm330_vm0, %v325_v0  ;;  %907 = vmatprep.subr.msk.mxu1 %vm330_vm0, %v404_v2  ;;  %s910_s8 = smul.u32 24, %s1171_s19  ;;  %s1175_s29 = smov (!%p291_p7, %s859_s29), 23  ;;  %v996_v12 = vmov 1966171168   ;;  %v543_v16 = vshrl.u32 %v542_v14, 7  ;;  %vm686_vm4 = vcmask 1040384  }
  0x11   : > { %908 = vmatpush3.msk.msra.mxu1 %vm330_vm0, %v404_v2  ;;  %893 = vmatprep.subr.msk.mxu0 %vm330_vm0, %v404_v2  ;;  %s1072_s6 = sadd.s32 %s909_s30, %s1173_s18  ;;  %v540_v13 = vunpack.c.l.s4 %v996_v12  ;;  %vm688_vm5 = vcmask 254976  }
  0x12   : > { %s858_s7 = sshll.u32 %s1072_s6, 3  ;;  %s1079_s12 = sadd.s32 %s910_s8, %s1175_s29  ;;  %v589_v21 = vsub.s32 0, %v543_v16 }
  0x13   : > { %s287_s11 = scalar_lea.vmem %s1154_s0, %s858_s7  ;;  %s860_s13 = sshll.u32 %s1079_s12, 3  ;;  %v541_v15 = vunpack.c.0.s8 %v540_v13 }
  0x14   : > { %v316_v3 = vld [vmem:[%s287_s11] sm:$0xff]  ;;  %s296_s16 = scalar_lea.vmem %s1155_s1, %s860_s13  ;;  %s1101_s19 = scalar_lea.vmem %s1158_s4, %s860_s13 }
  0x15   : > { %891 = vmatmul.mubr.msk.f32.vlgmr.msra.gmra.mxu0 %vm326_vm2, %v316_v3  ;;  %v319_v4 = vld [vmem:[%s296_s16 + $0x10] sm:$0xff]  ;;  %v320_v5 = vld [vmem:[%s296_s16 + $0x18] sm:$0xff]  ;;  %v317_v6 = vld [vmem:[%s296_s16] sm:$0xff]  ;;  %v544_v17 = vsub.s32 %v541_v15, %v543_v16  ;;  %s863_s25 = sshll.u32 %s1072_s6, 1 }
  0x16   : > { %894 = vmatpush3.msk.msra.mxu0 %vm330_vm0, %v404_v2  ;;  %898 = vmatprep.mubr.msk.f32.mxu1 %vm326_vm2, %v319_v4  ;;  %v318_v7 = vld [vmem:[%s296_s16 + $0x8] sm:$0xff]  ;;  %v321_v8 = vld [vmem:[%s296_s16 + $0x20] sm:$0xff]  ;;  %v323_v10 = vld [vmem:[%s296_s16 + $0x30] sm:$0xff]  ;;  %s315_s28 = scalar_lea.vmem %s1159_s5, %s863_s25 }
  0x17   : > { %895 = vmatprep.mubr.msk.f32.mxu0 %vm326_vm2, %v317_v6  ;;  %899 = vmatmul.mubr.msk.f32.vlgmr.msra.gmra.mxu1 %vm326_vm2, %v320_v5  ;;  %v322_v9 = vld [vmem:[%s296_s16 + $0x28] sm:$0xff]  ;;  %v324_v11 = vld [vmem:[%s296_s16 + $0x38] sm:$0xff] }
  0x18   : > { %901 = vmatprep.mubr.msk.f32.mxu1 %vm326_vm2, %v321_v8 }
  0x19   : > { %896 = vmatmul.mubr.msk.f32.vlgmr.msra.gmra.mxu0 %vm326_vm2, %v318_v7 }
  0x1b   : > { %902 = vmatmul.mubr.msk.f32.gmra.mxu1 %vm326_vm2, %v322_v9 }
  0x1c   : > { %904 = vmatprep.mubr.msk.f32.mxu1 %vm326_vm2, %v323_v10 }
  0x1f   : > { %905 = vmatmul.mubr.msk.f32.gmra.mxu1 %vm326_vm2, %v324_v11 }
  0xd5   : > { %v400_v18 = vpop.f32.mrf.mxu0 }
  0xd6   : > { %v538_v19 = vcombine.high %v400_v18, %v400_v18  ;;  %v545_v20 = vrot.slane %v400_v18, %v544_v17 }
  0xd7   : > { %v892_v22 = vpop.f32.mrf.mxu0  ;;  %v900_v29 = vpop.f32.mrf.mxu1 }
  0xd8   : > { %v552_v23 = vrot.slane %v538_v19, %v544_v17  ;;  %v553_v24 = vcombine.high %v545_v20, %v545_v20  ;;  %v561_v25 = vrot.slane %v545_v20, %v544_v17 }
  0xd9   : > { %v897_v30 = vpop.f32.mrf.mxu0  ;;  %v508_v37 = vpop.f32.mrf.mxu1 }
  0xda   : > { %v554_v26 = vcombine.high %v552_v23, %v552_v23  ;;  %v575_v27 = vrot.slane %v553_v24, %v544_v17  ;;  %v583_v28 = vcombine.high %v561_v25, %v561_v25  ;;  %v590_v31 = vrot.slane %v561_v25, %v589_v21 }
  0xdb   : > { %v568_v32 = vrot.slane %v552_v23, %v544_v17  ;;  %v498_v38 = vpop.f32.mrf.mxu0  ;;  %v903_v44 = vpop.f32.mrf.mxu1 }
  0xdc   : > { %v585_v33 = vcombine.high %v575_v27, %v575_v27  ;;  %v598_v34 = vrot.slane %v583_v28, %v589_v21  ;;  %v594_v35 = vrot.slane %v575_v27, %v589_v21  ;;  %v582_v36 = vrot.slane %v554_v26, %v544_v17 }
  0xdd   : > { %v584_v39 = vcombine.high %v568_v32, %v568_v32  ;;  %v627_v45 = vadd.f32 %v590_v31, %v498_v38  ;;  %v606_v46 = vrot.slane %v568_v32, %v589_v21  ;;  %v518_v55 = vpop.f32.mrf.mxu1 }
  0xde   : > { %v602_v40 = vrot.slane %v585_v33, %v589_v21  ;;  %v629_v41 = vadd.f32 %v598_v34, %v508_v37  ;;  %v628_v42 = vadd.f32 %v897_v30, %v594_v35  ;;  %v610_v43 = vrot.slane %v582_v36, %v589_v21 }
  0xdf   : > { %v586_v50 = vcombine.high %v582_v36, %v582_v36  ;;  %v636_v53 = vsel %vm635_vm3, %v627_v45, 0.0  ;;  %v657_v54 = vmul.f32 %v627_v45, %v627_v45  ;;  %690 = vst.msk [vmem:[%s1101_s19] sm:$0xff] %vm635_vm3, %v627_v45  ;;  %v614_v57 = vrot.slane %v584_v39, %v589_v21  ;;  %v906_v62 = vpop.f32.mrf.mxu1 }
  0xe0   : > { %v630_v47 = vadd.f32 %v900_v29, %v602_v40  ;;  %v659_v48 = vmul.f32 %v629_v41, %v629_v41  ;;  %692 = vst.msk [vmem:[%s1101_s19 + $0x10] sm:$0xff] %vm635_vm3, %v629_v41  ;;  %v637_v49 = vsel %vm635_vm3, %v628_v42, 0.0  ;;  %691 = vst.msk [vmem:[%s1101_s19 + $0x8] sm:$0xff] %vm635_vm3, %v628_v42  ;;  %v658_v51 = vmul.f32 %v628_v42, %v628_v42 }
  0xe1   : > { %v632_v52 = vadd.f32 %v903_v44, %v610_v43  ;;  %v638_v56 = vadd.f32 %v637_v49, %v636_v53  ;;  %v639_v59 = vsel %vm635_vm3, %v629_v41, 0.0  ;;  %v665_v61 = vsel %vm635_vm3, %v657_v54, 0.0  ;;  %v528_v5 = vpop.f32.mrf.mxu1 }
  0xe2   : > { %693 = vst.msk [vmem:[%s1101_s19 + $0x18] sm:$0xff] %vm635_vm3, %v630_v47  ;;  %v660_v58 = vmul.f32 %v630_v47, %v630_v47  ;;  %v666_v60 = vsel %vm635_vm3, %v658_v51, 0.0  ;;  %v631_v1 = vadd.f32 %v606_v46, %v518_v55  ;;  %v641_v2 = vsel %vm635_vm3, %v630_v47, 0.0 }
  0xe3   : > { %695 = vst.msk [vmem:[%s1101_s19 + $0x28] sm:$0xff] %vm635_vm3, %v632_v52  ;;  %v640_v63 = vadd.f32 %v639_v59, %v638_v56  ;;  %v667_v0 = vadd.f32 %v666_v60, %v665_v61  ;;  %v668_v3 = vsel %vm635_vm3, %v659_v48, 0.0  ;;  %v618_v4 = vrot.slane %v586_v50, %v589_v21 }
  0xe4   : > { %v662_v6 = vmul.f32 %v632_v52, %v632_v52  ;;  %v661_v9 = vmul.f32 %v631_v1, %v631_v1  ;;  %694 = vst.msk [vmem:[%s1101_s19 + $0x20] sm:$0xff] %vm635_vm3, %v631_v1  ;;  %v670_v10 = vsel %vm635_vm3, %v660_v58, 0.0  ;;  %v643_v11 = vsel %vm635_vm3, %v631_v1, 0.0 }
  0xe5   : > { %v669_v7 = vadd.f32 %v668_v3, %v667_v0  ;;  %v642_v8 = vadd.f32 %v641_v2, %v640_v63  ;;  %v634_v12 = vadd.f32 %v906_v62, %v618_v4  ;;  %v633_v13 = vadd.f32 %v614_v57, %v528_v5 }
  0xe6   : > { %v645_v16 = vsel %vm635_vm3, %v632_v52, 0.0  ;;  %v672_v17 = vsel %vm635_vm3, %v661_v9, 0.0  ;;  %v674_v21 = vsel %vm635_vm3, %v662_v6, 0.0 }
  0xe7   : > { %v644_v14 = vadd.f32 %v643_v11, %v642_v8  ;;  %v671_v15 = vadd.f32 %v670_v10, %v669_v7  ;;  %697 = vst.msk [vmem:[%s1101_s19 + $0x38] sm:$0xff] %vm635_vm3, %v634_v12  ;;  %v663_v18 = vmul.f32 %v633_v13, %v633_v13  ;;  %696 = vst.msk [vmem:[%s1101_s19 + $0x30] sm:$0xff] %vm635_vm3, %v633_v13  ;;  %v647_v23 = vsel %vm635_vm3, %v633_v13, 0.0 }
  0xe8   : > { %v664_v22 = vmul.f32 %v634_v12, %v634_v12  ;;  %v649_v26 = vsel %vm635_vm3, %v634_v12, 0.0 }
  0xe9   : > { %v673_v19 = vadd.f32 %v672_v17, %v671_v15  ;;  %v646_v20 = vadd.f32 %v645_v16, %v644_v14  ;;  %v676_v27 = vsel %vm635_vm3, %v663_v18, 0.0 }
  0xea   : > { %v678_v30 = vsel %vm635_vm3, %v664_v22, 0.0 }
  0xeb   : > { %v648_v24 = vadd.f32 %v647_v23, %v646_v20  ;;  %v675_v25 = vadd.f32 %v674_v21, %v673_v19 }
  0xed   : > { %v650_v28 = vadd.f32 %v649_v26, %v648_v24  ;;  %v677_v29 = vadd.f32 %v676_v27, %v675_v25 }
  0xef   : > { %v651_v31 = vrot.slane %v650_v28, 4  ;;  %v679_v32 = vadd.f32 %v678_v30, %v677_v29 }
  0xf1   : > { %v652_v33 = vadd.f32 %v651_v31, %v650_v28  ;;  %v680_v34 = vrot.slane %v679_v32, 4 }
  0xf3   : > { %v653_v35 = vrot.slane %v652_v33, 2  ;;  %v681_v36 = vadd.f32 %v680_v34, %v679_v32 }
  0xf5   : > { %v654_v37 = vadd.f32 %v653_v35, %v652_v33  ;;  %v682_v38 = vrot.slane %v681_v36, 2 }
  0xf7   : > { %v655_v39 = vrot.slane %v654_v37, 1  ;;  %v683_v40 = vadd.f32 %v682_v38, %v681_v36 }
  0xf9   : > { %v684_v41 = vrot.slane %v683_v40, 1  ;;  %v656_v42 = vadd.f32 %v655_v39, %v654_v37 }
  0xfb   : > { %v685_v43 = vadd.f32 %v684_v41, %v683_v40 }
  0xfd   : > { %v687_v44 = vsel %vm686_vm4, %v656_v42, %v685_v43 }
  0xfe   : > { %689 = vst.msk [vmem:[%s315_s28] sm:$0x3] %vm688_vm5, %v687_v44 }
  0xff PF: > { %s16_s22 = sadd.s32 1, %s992_s22   ;;  %s1160_s18 = smov %s984_s20 }
 0x100   : > { %p13_p8 = scmp.ge.s32.totalorder %s16_s22, 8   ;;  %s1161_s19 = smov %s988_s21 }
 0x101   : > { %s1162_s20 = smov %s1165_s23  ;;  %s1163_s21 = smov %s1169_s24 }
 0x102   :  { %15 = sbr.rel (!%p13_p8) target bundleno = 3 (0x3), region = 81 }

// kernel: edge_conv_forward.4
= control target key start
LH: loop header
LB: loop body
LE: loop exit
PB: predicated region body
PF: predicated region fallthrough
CT: control target
= control target key end

     0   :  { %s838_s18 = smov 0   ;;  %s840_s19 = smov 0   ;;  %s958_s0 = inlined_call_operand.vmem [shape: f32[2,192,32], index: 0, kind: input, shape index: {}]   ;;  %s959_s1 = inlined_call_operand.vmem [shape: f32[1,32], index: 1, kind: input, shape index: {}]   ;;  %s960_s2 = inlined_call_operand.vmem [shape: f32[1,32], index: 2, kind: input, shape index: {}]   ;;  %s961_s3 = inlined_call_operand.vmem [shape: f32[32,32], index: 3, kind: input, shape index: {}]   ;;  %s962_s4 = inlined_call_operand.vmem [shape: f32[2,192,32], index: 4, kind: output, shape index: {0}]   ;;  %s963_s5 = inlined_call_operand.vmem [shape: f32[2,3,2,32], index: 5, kind: output, shape index: {1}]  }
   0x1   :  { %s842_s20 = smov 0   ;;  %s844_s21 = smov 0  }
   0x2   :  { %s846_s22 = smov 0  }
   0x3 LB: > { %s25_s23 = sadd.s32 1, %s798_s20  ;;  %s28_s24 = sadd.s32 1, %s802_s21  ;;  %s806_s22 = sphi %s846_s22, %s16_s22   ;;  %s802_s21 = sphi %s844_s21, %s967_s21   ;;  %s798_s20 = sphi %s842_s20, %s966_s20   ;;  %s794_s19 = sphi %s840_s19, %s965_s19   ;;  %s790_s18 = sphi %s838_s18, %s964_s18  }
   0x4   : > { %p26_p0 = scmp.ge.s32.totalorder %s25_s23, 3  ;;  %p668_p1 = scmp.ge.s32.totalorder %s806_s22, 1 }
   0x5   : > { %p213_p2 = scmp.lt.s32.totalorder %s806_s22, 7 }
   0x6   : > { %s969_s23 = smov (%p26_p0, %s25_s23), 0  ;;  %s971_s24 = smov (!%p26_p0, %s28_s24), %s802_s21 }
   0x7   : > { %p214_p3 = pnand %p668_p1, %p213_p2  ;;  %p30_p4 = scmp.ge.s32.totalorder %s971_s24, 2 }
   0x8   : > { %s669_s29 = sshll.u32 (!%p214_p3), %s790_s18, 3  ;;  %p258_p5 = scmp.lt.s32.totalorder (!%p214_p3), %s794_s19, 1 }
   0x9   : > { %s973_s24 = smov (%p30_p4, %s971_s24), 0  ;;  %217 = sbr.rel (%p214_p3) target bundleno = 256 (0x100), region = 36 }
   0xa   : > { %p260_p6 = scmp.lt.s32.totalorder (!%p214_p3), %s669_s29, 23  ;;  %p279_p7 = scmp.lt.s32.totalorder (!%p214_p3), %s790_s18, 2 }
   0xe   : > { %v334_v0 = vld [vmem:[%s961_s3 + $0x18] sm:$0xff]  ;;  %v333_v1 = vld [vmem:[%s961_s3 + $0x10] sm:$0xff]  ;;  %v332_v2 = vld [vmem:[%s961_s3 + $0x8] sm:$0xff]  ;;  %s975_s19 = smov (!%p258_p5, %s794_s19), 1  ;;  %s977_s29 = smov (!%p260_p6, %s669_s29), 23  ;;  %vm335_vm0 = vcmask 261120  }
   0xf   : > { %698 = vmatprep.subr.mxu0 %v334_v0  ;;  %718 = vmatprep.subr.mxu1 %v334_v0  ;;  %v331_v3 = vld [vmem:[%s961_s3] sm:$0xff]  ;;  %s726_s9 = smul.u32 24, %s975_s19  ;;  %s979_s18 = smov (!%p279_p7, %s790_s18), 2  ;;  %vm515_vm1 = vcmask 1040384   ;;  %vm517_vm2 = vcmask 254976  }
  0x10   : > { %699 = vmatpush3.msra.mxu0 %v334_v0  ;;  %722 = vmatpush3.msra.mxu1 %v334_v0  ;;  %v674_v4 = vld [vmem:[%s959_s1] ss:$0 sm:$0xff] }
  0x11   : > { %700 = vmatprep.subr.mxu0 %v333_v1  ;;  %719 = vmatprep.subr.mxu1 %v333_v1  ;;  %s886_s10 = sadd.s32 %s726_s9, %s977_s29  ;;  %v675_v5 = vld [vmem:[%s960_s2] ss:$0 sm:$0xff]  ;;  %s727_s29 = smul.u32 3, %s975_s19 }
  0x12   : > { %701 = vmatpush3.msra.mxu0 %v333_v1  ;;  %723 = vmatpush3.msra.mxu1 %v333_v1  ;;  %s670_s11 = sshll.u32 %s886_s10, 3 }
  0x13   : > { %702 = vmatprep.subr.mxu0 %v332_v2  ;;  %720 = vmatprep.subr.mxu1 %v332_v2  ;;  %s265_s16 = scalar_lea.vmem %s958_s0, %s670_s11  ;;  %s275_s28 = scalar_lea.vmem %s962_s4, %s670_s11 }
  0x14   : > { %703 = vmatpush3.msra.mxu0 %v332_v2  ;;  %724 = vmatpush3.msra.mxu1 %v332_v2  ;;  %v285_v6 = vld [vmem:[%s265_s16] sm:$0xff]  ;;  %v286_v7 = vld [vmem:[%s265_s16 + $0x8] sm:$0xff]  ;;  %v287_v8 = vld [vmem:[%s265_s16 + $0x10] sm:$0xff]  ;;  %s282_s30 = sadd.s32 %s727_s29, %s979_s18 }
  0x15   : > { %704 = vmatprep.subr.mxu0 %v331_v3  ;;  %721 = vmatprep.subr.mxu1 %v331_v3  ;;  %v300_v9 = vmul.f32 %v674_v4, %v285_v6  ;;  %v301_v10 = vmul.f32 %v674_v4, %v286_v7  ;;  %v302_v11 = vmul.f32 %v674_v4, %v287_v8  ;;  %v288_v12 = vld [vmem:[%s265_s16 + $0x18] sm:$0xff]  ;;  %v289_v13 = vld [vmem:[%s265_s16 + $0x20] sm:$0xff]  ;;  %v290_v14 = vld [vmem:[%s265_s16 + $0x28] sm:$0xff]  ;;  %s673_s6 = sshll.u32 %s282_s30, 1 }
  0x16   : > { %705 = vmatpush3.msra.mxu0 %v331_v3  ;;  %725 = vmatpush3.msra.mxu1 %v331_v3  ;;  %v303_v15 = vmul.f32 %v674_v4, %v288_v12  ;;  %v304_v16 = vmul.f32 %v674_v4, %v289_v13  ;;  %v305_v17 = vmul.f32 %v674_v4, %v290_v14  ;;  %v291_v18 = vld [vmem:[%s265_s16 + $0x30] sm:$0xff]  ;;  %v292_v19 = vld [vmem:[%s265_s16 + $0x38] sm:$0xff]  ;;  %s284_s9 = scalar_lea.vmem %s963_s5, %s673_s6 }
  0x17   : > { %v315_v20 = vadd.f32 %v675_v5, %v300_v9  ;;  %v316_v21 = vadd.f32 %v675_v5, %v301_v10  ;;  %v317_v22 = vadd.f32 %v675_v5, %v302_v11  ;;  %v306_v23 = vmul.f32 %v674_v4, %v291_v18 }
  0x18   : > { %v318_v24 = vadd.f32 %v675_v5, %v303_v15  ;;  %v319_v25 = vadd.f32 %v675_v5, %v304_v16  ;;  %v320_v26 = vadd.f32 %v675_v5, %v305_v17  ;;  %v307_v27 = vmul.f32 %v674_v4, %v292_v19 }
  0x19   : > { %v323_v28 = vmax.f32 %v315_v20, 0.0  ;;  %v324_v29 = vmax.f32 %v316_v21, 0.0  ;;  %v325_v30 = vmax.f32 %v317_v22, 0.0  ;;  %v321_v31 = vadd.f32 %v675_v5, %v306_v23 }
  0x1a   : > { %v327_v32 = vmax.f32 %v319_v25, 0.0  ;;  %v328_v33 = vmax.f32 %v320_v26, 0.0  ;;  %v322_v34 = vadd.f32 %v675_v5, %v307_v27  ;;  %v326_v36 = vmax.f32 %v318_v24, 0.0 }
  0x1b   : > { %706 = vmatprep.mubr.msk.f32.mxu0 %vm335_vm0, %v323_v28  ;;  %v329_v35 = vmax.f32 %v321_v31, 0.0 }
  0x1c   : > { %707 = vmatmul.mubr.msk.f32.vlgmr.msra.gmra.mxu0 %vm335_vm0, %v324_v29  ;;  %712 = vmatprep.mubr.msk.f32.mxu1 %vm335_vm0, %v327_v32  ;;  %v330_v37 = vmax.f32 %v322_v34, 0.0 }
  0x1d   : > { %709 = vmatprep.mubr.msk.f32.mxu0 %vm335_vm0, %v325_v30  ;;  %713 = vmatmul.mubr.msk.f32.vlgmr.msra.gmra.mxu1 %vm335_vm0, %v328_v33 }
  0x1e   : > { %715 = vmatprep.mubr.msk.f32.mxu1 %vm335_vm0, %v329_v35 }
  0x20   : > { %710 = vmatmul.mubr.msk.f32.gmra.mxu0 %vm335_vm0, %v326_v36 }
  0x21   : > { %716 = vmatmul.mubr.msk.f32.gmra.mxu1 %vm335_vm0, %v330_v37 }
  0xdc   : > { %v708_v38 = vpop.f32.mrf.mxu0 }
  0xdd   : > { %520 = vst.msk [vmem:[%s275_s28 + $0x8] sm:$0xff] %vm335_vm0, %v708_v38  ;;  %v714_v39 = vpop.f32.mrf.mxu1  ;;  %v487_v41 = vmul.f32 %v708_v38, %v708_v38  ;;  %v466_v46 = vsel %vm335_vm0, %v708_v38, 0.0 }
  0xde   : > { %v426_v40 = vpop.f32.mrf.mxu0  ;;  %524 = vst.msk [vmem:[%s275_s28 + $0x28] sm:$0xff] %vm335_vm0, %v714_v39  ;;  %v491_v0 = vmul.f32 %v714_v39, %v714_v39  ;;  %v474_v4 = vsel %vm335_vm0, %v714_v39, 0.0 }
  0xdf   : > { %v465_v42 = vsel %vm335_vm0, %v426_v40, 0.0  ;;  %v486_v43 = vmul.f32 %v426_v40, %v426_v40  ;;  %519 = vst.msk [vmem:[%s275_s28] sm:$0xff] %vm335_vm0, %v426_v40  ;;  %v446_v44 = vpop.f32.mrf.mxu1  ;;  %v495_v51 = vsel %vm335_vm0, %v487_v41, 0.0 }
  0xe0   : > { %v711_v45 = vpop.f32.mrf.mxu0  ;;  %523 = vst.msk [vmem:[%s275_s28 + $0x20] sm:$0xff] %vm335_vm0, %v446_v44  ;;  %v467_v49 = vadd.f32 %v466_v46, %v465_v42  ;;  %v490_v60 = vmul.f32 %v446_v44, %v446_v44  ;;  %v472_v1 = vsel %vm335_vm0, %v446_v44, 0.0  ;;  %v503_v9 = vsel %vm335_vm0, %v491_v0, 0.0 }
  0xe1   : > { %v494_v47 = vsel %vm335_vm0, %v486_v43, 0.0  ;;  %522 = vst.msk [vmem:[%s275_s28 + $0x18] sm:$0xff] %vm335_vm0, %v711_v45  ;;  %v717_v48 = vpop.f32.mrf.mxu1  ;;  %v489_v52 = vmul.f32 %v711_v45, %v711_v45  ;;  %v470_v58 = vsel %vm335_vm0, %v711_v45, 0.0 }
  0xe2   : > { %v436_v50 = vpop.f32.mrf.mxu0  ;;  %526 = vst.msk [vmem:[%s275_s28 + $0x38] sm:$0xff] %vm335_vm0, %v717_v48  ;;  %v496_v56 = vadd.f32 %v495_v51, %v494_v47  ;;  %v501_v5 = vsel %vm335_vm0, %v490_v60, 0.0  ;;  %v493_v10 = vmul.f32 %v717_v48, %v717_v48  ;;  %v478_v14 = vsel %vm335_vm0, %v717_v48, 0.0 }
  0xe3   : > { %v468_v53 = vsel %vm335_vm0, %v436_v50, 0.0  ;;  %v488_v54 = vmul.f32 %v436_v50, %v436_v50  ;;  %521 = vst.msk [vmem:[%s275_s28 + $0x10] sm:$0xff] %vm335_vm0, %v436_v50  ;;  %v456_v55 = vpop.f32.mrf.mxu1  ;;  %v499_v63 = vsel %vm335_vm0, %v489_v52, 0.0 }
  0xe4   : > { %v469_v57 = vadd.f32 %v468_v53, %v467_v49  ;;  %525 = vst.msk [vmem:[%s275_s28 + $0x30] sm:$0xff] %vm335_vm0, %v456_v55  ;;  %v492_v6 = vmul.f32 %v456_v55, %v456_v55  ;;  %v476_v11 = vsel %vm335_vm0, %v456_v55, 0.0  ;;  %v507_v18 = vsel %vm335_vm0, %v493_v10, 0.0 }
  0xe5   : > { %v497_v59 = vsel %vm335_vm0, %v488_v54, 0.0 }
  0xe6   : > { %v471_v61 = vadd.f32 %v470_v58, %v469_v57  ;;  %v498_v62 = vadd.f32 %v497_v59, %v496_v56  ;;  %v505_v15 = vsel %vm335_vm0, %v492_v6, 0.0 }
  0xe8   : > { %v500_v2 = vadd.f32 %v499_v63, %v498_v62  ;;  %v473_v3 = vadd.f32 %v472_v1, %v471_v61 }
  0xea   : > { %v502_v7 = vadd.f32 %v501_v5, %v500_v2  ;;  %v475_v8 = vadd.f32 %v474_v4, %v473_v3 }
  0xec   : > { %v477_v12 = vadd.f32 %v476_v11, %v475_v8  ;;  %v504_v13 = vadd.f32 %v503_v9, %v502_v7 }
  0xee   : > { %v479_v16 = vadd.f32 %v478_v14, %v477_v12  ;;  %v506_v17 = vadd.f32 %v505_v15, %v504_v13 }
  0xf0   : > { %v480_v19 = vrot.slane %v479_v16, 4  ;;  %v508_v20 = vadd.f32 %v507_v18, %v506_v17 }
  0xf2   : > { %v481_v21 = vadd.f32 %v480_v19, %v479_v16  ;;  %v509_v22 = vrot.slane %v508_v20, 4 }
  0xf4   : > { %v482_v23 = vrot.slane %v481_v21, 2  ;;  %v510_v24 = vadd.f32 %v509_v22, %v508_v20 }
  0xf6   : > { %v483_v25 = vadd.f32 %v482_v23, %v481_v21  ;;  %v511_v26 = vrot.slane %v510_v24, 2 }
  0xf8   : > { %v484_v27 = vrot.slane %v483_v25, 1  ;;  %v512_v28 = vadd.f32 %v511_v26, %v510_v24 }
  0xfa   : > { %v513_v29 = vrot.slane %v512_v28, 1  ;;  %v485_v30 = vadd.f32 %v484_v27, %v483_v25 }
  0xfc   : > { %v514_v31 = vadd.f32 %v513_v29, %v512_v28 }
  0xfe   : > { %v516_v32 = vsel %vm515_vm1, %v485_v30, %v514_v31 }
  0xff   : > { %518 = vst.msk [vmem:[%s284_s9] sm:$0x3] %vm517_vm2, %v516_v32 }
 0x100 PF: > { %s16_s22 = sadd.s32 1, %s806_s22   ;;  %s964_s18 = smov %s798_s20 }
 0x101   : > { %p13_p8 = scmp.ge.s32.totalorder %s16_s22, 8   ;;  %s965_s19 = smov %s802_s21 }
 0x102   : > { %s966_s20 = smov %s969_s23  ;;  %s967_s21 = smov %s973_s24 }
 0x103   :  { %15 = sbr.rel (!%p13_p8) target bundleno = 3 (0x3), region = 78 }

// kernel: edge_conv_forward.5
= control target key start
LH: loop header
LB: loop body
LE: loop exit
PB: predicated region body
PF: predicated region fallthrough
CT: control target
= control target key end

     0   :  { %s534_s12 = smov 0   ;;  %s536_s13 = smov 0   ;;  %s614_s0 = inlined_call_operand.vmem [shape: f32[2,192,32], index: 0, kind: input, shape index: {}]   ;;  %s615_s1 = inlined_call_operand.vmem [shape: f32[1,32], index: 1, kind: input, shape index: {}]   ;;  %s616_s2 = inlined_call_operand.vmem [shape: f32[1,32], index: 2, kind: input, shape index: {}]   ;;  %s617_s3 = inlined_call_operand.vmem [shape: f32[2,24,32], index: 3, kind: output, shape index: {}]  }
   0x1   :  { %s538_s14 = smov 0   ;;  %s540_s15 = smov 0  }
   0x2   :  { %s542_s16 = smov 0  }
   0x3 LB: > { %s22_s17 = sadd.s32 1, %s504_s14  ;;  %s25_s18 = sadd.s32 1, %s508_s15  ;;  %s512_s16 = sphi %s542_s16, %s13_s16   ;;  %s508_s15 = sphi %s540_s15, %s621_s15   ;;  %s504_s14 = sphi %s538_s14, %s620_s14   ;;  %s500_s13 = sphi %s536_s13, %s619_s13   ;;  %s496_s12 = sphi %s534_s12, %s618_s12  }
   0x4   : > { %p23_p0 = scmp.ge.s32.totalorder %s22_s17, 3  ;;  %p424_p1 = scmp.ge.s32.totalorder %s512_s16, 1 }
   0x5   : > { %p158_p2 = scmp.lt.s32.totalorder %s512_s16, 7 }
   0x6   : > { %s623_s17 = smov (%p23_p0, %s22_s17), 0  ;;  %s625_s18 = smov (!%p23_p0, %s25_s18), %s508_s15 }
   0x7   : > { %p159_p3 = pnand %p424_p1, %p158_p2  ;;  %p27_p4 = scmp.ge.s32.totalorder %s625_s18, 2 }
   0x8   : > { %s425_s19 = sshll.u32 (!%p159_p3), %s496_s12, 3  ;;  %p190_p5 = scmp.lt.s32.totalorder (!%p159_p3), %s500_s13, 1 }
   0x9   : > { %s627_s18 = smov (%p27_p4, %s625_s18), 0  ;;  %162 = sbr.rel (%p159_p3) target bundleno = 48 (0x30), region = 32 }
   0xa   : > { %p192_p6 = scmp.lt.s32.totalorder (!%p159_p3), %s425_s19, 23  ;;  %p201_p7 = scmp.lt.s32.totalorder (!%p159_p3), %s496_s12, 2 }
   0xe   : > { %s629_s13 = smov (!%p190_p5, %s500_s13), 1  ;;  %s631_s19 = smov (!%p192_p6, %s425_s19), 23  ;;  %v428_v0 = vld [vmem:[%s615_s1] ss:$0 sm:$0xff]  ;;  %vm253_vm0 = vcmask 261120   ;;  %vm318_vm1 = vcmask 1041409  }
   0xf   : > { %s432_s20 = smul.u32 24, %s629_s13  ;;  %v429_v1 = vld [vmem:[%s616_s2] ss:$0 sm:$0xff]  ;;  %vm320_vm2 = vcmask 1042434   ;;  %vm322_vm3 = vcmask 1043459   ;;  %s633_s12 = smov (!%p201_p7, %s496_s12), 2 }
  0x10   : > { %s433_s30 = smul.u32 3, %s629_s13  ;;  %vm324_vm4 = vcmask 1044484   ;;  %vm326_vm5 = vcmask 1045509   ;;  %vm328_vm6 = vcmask 1046534   ;;  %vm330_vm7 = vcmask 1047559  }
  0x11   : > { %s195_s21 = sadd.s32 %s432_s20, %s631_s19 }
  0x12   : > { %s426_s22 = sshll.u32 %s195_s21, 3  ;;  %s204_s4 = sadd.s32 %s433_s30, %s633_s12 }
  0x13   : > { %s197_s27 = scalar_lea.vmem %s614_s0, %s426_s22  ;;  %s427_s5 = sshll.u32 %s204_s4, 3 }
  0x14   : > { %v207_v2 = vld [vmem:[%s197_s27] sm:$0xff]  ;;  %v208_v3 = vld [vmem:[%s197_s27 + $0x8] sm:$0xff]  ;;  %v209_v4 = vld [vmem:[%s197_s27 + $0x10] sm:$0xff]  ;;  %s206_s8 = scalar_lea.vmem %s617_s3, %s427_s5 }
  0x15   : > { %v210_v5 = vld [vmem:[%s197_s27 + $0x18] sm:$0xff]  ;;  %v211_v6 = vld [vmem:[%s197_s27 + $0x20] sm:$0xff]  ;;  %v212_v7 = vld [vmem:[%s197_s27 + $0x28] sm:$0xff]  ;;  %v222_v8 = vmul.f32 %v428_v0, %v207_v2  ;;  %v223_v9 = vmul.f32 %v428_v0, %v208_v3  ;;  %v224_v10 = vmul.f32 %v428_v0, %v209_v4 }
  0x16   : > { %v213_v11 = vld [vmem:[%s197_s27 + $0x30] sm:$0xff]  ;;  %v214_v12 = vld [vmem:[%s197_s27 + $0x38] sm:$0xff]  ;;  %v225_v13 = vmul.f32 %v428_v0, %v210_v5  ;;  %v226_v14 = vmul.f32 %v428_v0, %v211_v6  ;;  %v227_v15 = vmul.f32 %v428_v0, %v212_v7 }
  0x17   : > { %v228_v16 = vmul.f32 %v428_v0, %v213_v11  ;;  %v229_v17 = vmul.f32 %v428_v0, %v214_v12  ;;  %v237_v18 = vadd.f32 %v429_v1, %v222_v8  ;;  %v238_v19 = vadd.f32 %v429_v1, %v223_v9 }
  0x18   : > { %v239_v20 = vadd.f32 %v429_v1, %v224_v10  ;;  %v240_v21 = vadd.f32 %v429_v1, %v225_v13  ;;  %v241_v22 = vadd.f32 %v429_v1, %v226_v14  ;;  %v242_v23 = vadd.f32 %v429_v1, %v227_v15 }
  0x19   : > { %v243_v24 = vadd.f32 %v429_v1, %v228_v16  ;;  %v244_v25 = vadd.f32 %v429_v1, %v229_v17  ;;  %v245_v26 = vmax.f32 %v237_v18, 0.0  ;;  %v246_v27 = vmax.f32 %v238_v19, 0.0 }
  0x1a   : > { %v247_v28 = vmax.f32 %v239_v20, 0.0  ;;  %v248_v29 = vmax.f32 %v240_v21, 0.0  ;;  %v249_v30 = vmax.f32 %v241_v22, 0.0  ;;  %v250_v31 = vmax.f32 %v242_v23, 0.0 }
  0x1b   : > { %v251_v32 = vmax.f32 %v243_v24, 0.0  ;;  %v252_v33 = vmax.f32 %v244_v25, 0.0  ;;  %v254_v34 = vsel %vm253_vm0, %v245_v26, -inf  ;;  %v261_v35 = vsel %vm253_vm0, %v246_v27, -inf }
  0x1c   : > { %v255_v36 = vrot.slane %v254_v34, 4  ;;  %v262_v37 = vrot.slane %v261_v35, 4  ;;  %v268_v38 = vsel %vm253_vm0, %v247_v28, -inf  ;;  %v275_v39 = vsel %vm253_vm0, %v248_v29, -inf }
  0x1d   : > { %v269_v40 = vrot.slane %v268_v38, 4  ;;  %v276_v41 = vrot.slane %v275_v39, 4  ;;  %v282_v42 = vsel %vm253_vm0, %v249_v30, -inf  ;;  %v289_v43 = vsel %vm253_vm0, %v250_v31, -inf }
  0x1e   : > { %v256_v44 = vmax.f32 %v254_v34, %v255_v36  ;;  %v263_v45 = vmax.f32 %v261_v35, %v262_v37  ;;  %v283_v46 = vrot.slane %v282_v42, 4  ;;  %v290_v47 = vrot.slane %v289_v43, 4 }
  0x1f   : > { %v270_v48 = vmax.f32 %v268_v38, %v269_v40  ;;  %v277_v49 = vmax.f32 %v275_v39, %v276_v41  ;;  %v296_v50 = vsel %vm253_vm0, %v251_v32, -inf  ;;  %v303_v51 = vsel %vm253_vm0, %v252_v33, -inf }
  0x20   : > { %v257_v52 = vrot.slane %v256_v44, 2  ;;  %v264_v53 = vrot.slane %v263_v45, 2  ;;  %v284_v54 = vmax.f32 %v282_v42, %v283_v46  ;;  %v291_v55 = vmax.f32 %v289_v43, %v290_v47 }
  0x21   : > { %v271_v56 = vrot.slane %v270_v48, 2  ;;  %v278_v57 = vrot.slane %v277_v49, 2  ;;  %v297_v58 = vrot.slane %v296_v50, 4  ;;  %v304_v59 = vrot.slane %v303_v51, 4 }
  0x22   : > { %v258_v60 = vmax.f32 %v256_v44, %v257_v52  ;;  %v265_v61 = vmax.f32 %v263_v45, %v264_v53  ;;  %v285_v62 = vrot.slane %v284_v54, 2  ;;  %v292_v63 = vrot.slane %v291_v55, 2 }
  0x23   : > { %v272_v0 = vmax.f32 %v270_v48, %v271_v56  ;;  %v279_v1 = vmax.f32 %v277_v49, %v278_v57  ;;  %v298_v2 = vmax.f32 %v296_v50, %v297_v58  ;;  %v305_v3 = vmax.f32 %v303_v51, %v304_v59 }
  0x24   : > { %v259_v4 = vrot.slane %v258_v60, 1  ;;  %v266_v5 = vrot.slane %v265_v61, 1  ;;  %v286_v6 = vmax.f32 %v284_v54, %v285_v62  ;;  %v293_v7 = vmax.f32 %v291_v55, %v292_v63 }
  0x25   : > { %v273_v8 = vrot.slane %v272_v0, 1  ;;  %v280_v9 = vrot.slane %v279_v1, 1  ;;  %v299_v10 = vrot.slane %v298_v2, 2  ;;  %v306_v11 = vrot.slane %v305_v3, 2 }
  0x26   : > { %v260_v12 = vmax.f32 %v258_v60, %v259_v4  ;;  %v267_v13 = vmax.f32 %v265_v61, %v266_v5  ;;  %v287_v14 = vrot.slane %v286_v6, 1  ;;  %v294_v15 = vrot.slane %v293_v7, 1 }
  0x27   : > { %v274_v16 = vmax.f32 %v272_v0, %v273_v8  ;;  %v281_v17 = vmax.f32 %v279_v1, %v280_v9  ;;  %v300_v18 = vmax.f32 %v298_v2, %v299_v10  ;;  %v307_v19 = vmax.f32 %v305_v3, %v306_v11 }
  0x28   : > { %v288_v20 = vmax.f32 %v286_v6, %v287_v14  ;;  %v295_v21 = vmax.f32 %v293_v7, %v294_v15  ;;  %v319_v22 = vsel %vm318_vm1, %v267_v13, %v260_v12 }
  0x29   : > { %v301_v23 = vrot.slane %v300_v18, 1  ;;  %v308_v24 = vrot.slane %v307_v19, 1  ;;  %v321_v25 = vsel %vm320_vm2, %v274_v16, %v319_v22 }
  0x2a   : > { %v323_v26 = vsel %vm322_vm3, %v281_v17, %v321_v25 }
  0x2b   : > { %v302_v27 = vmax.f32 %v300_v18, %v301_v23  ;;  %v309_v28 = vmax.f32 %v307_v19, %v308_v24  ;;  %v325_v29 = vsel %vm324_vm4, %v288_v20, %v323_v26 }
  0x2c   : > { %v327_v30 = vsel %vm326_vm5, %v295_v21, %v325_v29 }
  0x2d   : > { %v329_v31 = vsel %vm328_vm6, %v302_v27, %v327_v30 }
  0x2e   : > { %v331_v32 = vsel %vm330_vm7, %v309_v28, %v329_v31 }
  0x2f   : > { %333 = vst.msk [vmem:[%s206_s8] sm:$0xff] %vm253_vm0, %v331_v32 }
  0x30 PF: > { %s13_s16 = sadd.s32 1, %s512_s16   ;;  %s618_s12 = smov %s504_s14 }
  0x31   : > { %p10_p8 = scmp.ge.s32.totalorder %s13_s16, 8   ;;  %s619_s13 = smov %s508_s15 }
  0x32   : > { %s620_s14 = smov %s623_s17  ;;  %s621_s15 = smov %s627_s18 }
  0x33   :  { %12 = sbr.rel (!%p10_p8) target bundleno = 3 (0x3), region = 62 }

</bundles_post_ra>
